<compile_context>
chip_gen: v7x
topology: tpu7x:2x2x1
jax: 0.10.0
libtpu: 0.0.40
codegen_flags: <defaults>
</compile_context>

<pallas_src>
import functools

import jax
import jax.numpy as jnp
from jax.experimental import pallas as pl
from jax.experimental.pallas import tpu as pltpu


def _round_up(n: int, m: int) -> int:
    return ((n + m - 1) // m) * m


def _pad2(x, shape):
    pads = [(0, t - s) for s, t in zip(x.shape, shape)]
    return jnp.pad(x, pads)


def _choose_tb(B: int, tb_max: int) -> int:
    """Batch tile: as large as allowed, multiple of 8, >=2 grid steps if possible."""
    tb = min(max(tb_max, 8), _round_up(B, 8))
    tb = _round_up(tb, 8)
    # Keep at least 2 grid steps when the batch allows, so the "parallel"
    # batch axis can be split across v7x's 2 TensorCores (and so the demo
    # actually exercises the cross-step prefetch on the DMA path).
    if _round_up(B, tb) // tb < 2 and tb > 8:
        tb = _round_up(tb // 2, 8)
    return tb


# ----------------------------------------------------------------------------
# Kernel 1: small-table fast path — folded table resident in VMEM.
# ----------------------------------------------------------------------------
def _vmem_table_kernel(ids_ref,              # VMEM (tb, 1) int32
                       feat_ref,             # VMEM (tb, Fp) f32
                       table_ref,            # VMEM (Vp, Dp) bf16 (resident)
                       w1_ref, b1_ref,       # VMEM (Fp, Hp) bf16, (1, Hp) f32
                       w2_ref, bout_ref,     # VMEM (Hp, Dp) bf16, (1, Dp) f32
                       out_ref):             # VMEM (tb, Dp) f32
    tb = out_ref.shape[0]
    vp = table_ref.shape[0]

    # "Gather" via one-hot matmul: for small Vp this is a handful of MXU
    # passes, needs no DMA/semaphores, and is lane-dense.
    ids = ids_ref[...]                                          # (tb, 1)
    cols = jax.lax.broadcasted_iota(jnp.int32, (tb, vp), 1)     # (tb, Vp)
    onehot = (cols == ids).astype(table_ref.dtype)              # bf16 one-hot
    id_part = jnp.dot(onehot, table_ref[...],
                      preferred_element_type=jnp.float32)       # (tb, Dp) f32

    # Feature MLP (projection already folded into w2 / b_out).
    xb = feat_ref[...].astype(jnp.bfloat16)
    h = jnp.dot(xb, w1_ref[...], preferred_element_type=jnp.float32) + b1_ref[...]
    h = jnp.maximum(h, 0.0)
    feat_part = jnp.dot(h.astype(jnp.bfloat16), w2_ref[...],
                        preferred_element_type=jnp.float32) + bout_ref[...]

    out_ref[...] = (id_part + feat_part).astype(out_ref.dtype)


@functools.partial(jax.jit, static_argnames=("tb",))
def _forward_vmem(ids2d, feat, table, w1, b1, w2, b_out, *, tb):
    Bp, Fp = feat.shape
    Vp, Dp = table.shape
    Hp = w1.shape[1]
    return pl.pallas_call(
        _vmem_table_kernel,
        out_shape=jax.ShapeDtypeStruct((Bp, Dp), jnp.float32),
        grid_spec=pltpu.PrefetchScalarGridSpec(
            num_scalar_prefetch=0,
            grid=(Bp // tb,),
            in_specs=[
                pl.BlockSpec((tb, 1), lambda i: (i, 0)),    # ids column
                pl.BlockSpec((tb, Fp), lambda i: (i, 0)),   # features tile
                pl.BlockSpec((Vp, Dp), lambda i: (0, 0)),   # table (resident)
                pl.BlockSpec((Fp, Hp), lambda i: (0, 0)),   # w1 (resident)
                pl.BlockSpec((1, Hp), lambda i: (0, 0)),    # b1
                pl.BlockSpec((Hp, Dp), lambda i: (0, 0)),   # w2 (folded)
                pl.BlockSpec((1, Dp), lambda i: (0, 0)),    # b_out (folded)
            ],
            out_specs=pl.BlockSpec((tb, Dp), lambda i: (i, 0)),
        ),
        compiler_params=pltpu.CompilerParams(
            dimension_semantics=("parallel",)),             # batch split over TCs
    )(ids2d, feat, table, w1, b1, w2, b_out)


# ----------------------------------------------------------------------------
# Kernel 2: general path — table in HBM, double-buffered row-gather DMAs.
# ----------------------------------------------------------------------------
def _hbm_table_kernel(ids_ref,               # SMEM (Bp,) int32 (scalar prefetch)
                      feat_ref,              # VMEM (tb, Fp) f32
                      table_ref,             # HBM (ANY) (Vp, Dp) bf16
                      w1_ref, b1_ref,        # VMEM (Fp, Hp) bf16, (1, Hp) f32
                      w2_ref, bout_ref,      # VMEM (Hp, Dp) bf16, (1, Dp) f32
                      out_ref,               # VMEM (tb, Dp) f32
                      gather_ref,            # VMEM scratch (2, tb, Dp) bf16
                      sem_ref):              # DMA sems (2, tb)
    i = pl.program_id(0)
    nsteps = pl.num_programs(0)
    tb = out_ref.shape[0]
    vp = table_ref.shape[0]
    slot = i % 2

    def row_copy(step, r, slot_idx):
        # Exact descriptor for row r of grid step `step` into buffer `slot_idx`;
        # rebuilt identically for start and wait so byte counts always match.
        uid = jnp.clip(ids_ref[step * tb + r], 0, vp - 1)   # guard OOB ids
        return pltpu.make_async_copy(
            table_ref.at[pl.ds(uid, 1), :],
            gather_ref.at[slot_idx, pl.ds(r, 1), :],
            sem_ref.at[slot_idx, r])

    # Prime the pipeline: the very first step fetches its own rows.
    @pl.when(i == 0)
    def _():
        for r in range(tb):
            row_copy(0, r, 0).start()

    # Prefetch the NEXT step's rows into the other slot; all ids are already
    # in SMEM, so this overlaps this step's MLP compute + output store.
    @pl.when(i + 1 < nsteps)
    def _():
        for r in range(tb):
            row_copy(i + 1, r, 1 - slot).start()

    # Feature MLP (projection folded into w2 / b_out at prep time).
    xb = feat_ref[...].astype(jnp.bfloat16)
    h = jnp.dot(xb, w1_ref[...], preferred_element_type=jnp.float32) + b1_ref[...]
    h = jnp.maximum(h, 0.0)
    feat_part = jnp.dot(h.astype(jnp.bfloat16), w2_ref[...],
                        preferred_element_type=jnp.float32) + bout_ref[...]

    # Wait for this step's gathered rows (started here at i==0, otherwise at i-1).
    for r in range(tb):
        row_copy(i, r, slot).wait()

    out_ref[...] = (gather_ref[slot].astype(jnp.float32) + feat_part).astype(out_ref.dtype)


@functools.partial(jax.jit, static_argnames=("tb",))
def _forward_hbm(ids, feat, table, w1, b1, w2, b_out, *, tb):
    Bp, Fp = feat.shape
    Vp, Dp = table.shape
    Hp = w1.shape[1]
    return pl.pallas_call(
        _hbm_table_kernel,
        out_shape=jax.ShapeDtypeStruct((Bp, Dp), jnp.float32),
        grid_spec=pltpu.PrefetchScalarGridSpec(
            num_scalar_prefetch=1,                          # user ids -> SMEM
            grid=(Bp // tb,),
            in_specs=[
                pl.BlockSpec((tb, Fp), lambda i, ids: (i, 0)),   # features tile
                pl.BlockSpec(memory_space=pl.ANY),               # table in HBM
                pl.BlockSpec((Fp, Hp), lambda i, ids: (0, 0)),   # w1 (resident)
                pl.BlockSpec((1, Hp), lambda i, ids: (0, 0)),    # b1
                pl.BlockSpec((Hp, Dp), lambda i, ids: (0, 0)),   # w2 (folded)
                pl.BlockSpec((1, Dp), lambda i, ids: (0, 0)),    # b_out (folded)
            ],
            out_specs=pl.BlockSpec((tb, Dp), lambda i, ids: (i, 0)),
            scratch_shapes=[
                pltpu.VMEM((2, tb, Dp), table.dtype),   # double-buffered gather
                pltpu.SemaphoreType.DMA((2, tb)),       # one sem per slot/row
            ],
        ),
        # Cross-step prefetch keeps state in scratch, so the grid must run
        # in order on one core ("arbitrary"); a v7x core split would need an
        # explicit leading core axis with per-core priming.
        compiler_params=pltpu.CompilerParams(
            dimension_semantics=("arbitrary",)),
    )(ids, feat, table, w1, b1, w2, b_out)


# ----------------------------------------------------------------------------
# Public wrapper (not jitted: B/D/tb stay Python ints, fixing the slicing bug)
# ----------------------------------------------------------------------------
def user_embedding_forward(user_ids, user_features, kp, *, tb=128,
                           vmem_table_limit_bytes=8 << 20):
    """Pallas-backed forward of UserEmbedding. Returns (B, D) float32."""
    B = user_ids.shape[0]
    F = user_features.shape[1]
    D = int(kp["D"])
    table = kp["table"]
    Fp = kp["w1"].shape[0]

    tb = _choose_tb(B, tb)
    Bp = _round_up(B, tb)

    # Pad the batch to a multiple of the batch tile (extra rows are inert).
    ids = jnp.zeros((Bp,), jnp.int32).at[:B].set(user_ids.astype(jnp.int32))
    feat = jnp.zeros((Bp, Fp), jnp.float32).at[:B, :F].set(
        user_features.astype(jnp.float32))

    table_bytes = table.size * table.dtype.itemsize
    if table_bytes <= vmem_table_limit_bytes:
        out = _forward_vmem(ids[:, None], feat, table, kp["w1"], kp["b1"],
                            kp["w2"], kp["b_out"], tb=tb)
    else:
        out = _forward_hbm(ids, feat, table, kp["w1"], kp["b1"],
                           kp["w2"], kp["b_out"], tb=tb)
    return out[:B, :D]


# ----------------------------------------------------------------------------
# Parameters
# ----------------------------------------------------------------------------
def init_params(key, user_num, embedding_dim, padding_idx,
                feature_dim, feature_hidden_dim):
    """Un-folded parameters, matching nn.Module layout (weights stored (in,out))."""
    V, D, F, H = user_num + 1, embedding_dim, feature_dim, feature_hidden_dim
    ks = jax.random.split(key, 4)
    table = jax.random.normal(ks[0], (V, D), jnp.float32)
    table = table.at[padding_idx].set(0.0)

    def lin(k, fan_in, fan_out):
        kw, kb = jax.random.split(k)
        bound = 1.0 / jnp.sqrt(fan_in)
        w = jax.random.uniform(kw, (fan_in, fan_out), jnp.float32, -bound, bound)
        b = jax.random.uniform(kb, (1, fan_out), jnp.float32, -bound, bound)
        return w, b

    w1, b1 = lin(ks[1], F, H)        # feature_embedding[0]
    w2, b2 = lin(ks[2], H, D)        # feature_embedding[2]
    wp, bp = lin(ks[3], 2 * D, D)    # projection (in = 2*D when features given)
    return dict(table=table, w1=w1, b1=b1, w2=w2, b2=b2, wp=wp, bp=bp)


def prepare_kernel_params(p, lane=128):
    """Fold the projection into the table / MLP, pad to TPU shapes, cast to bf16."""
    V, D = p["table"].shape
    F, H = p["w1"].shape
    Fp, Hp, Dp = _round_up(F, lane), _round_up(H, lane), _round_up(D, lane)
    Vp = _round_up(V, lane)

    wp_id, wp_ft = p["wp"][:D, :], p["wp"][D:, :]
    table_fold = p["table"] @ wp_id            # (V, D)  id path folded w/ projection
    w2_fold = p["w2"] @ wp_ft                  # (H, D)
    b_out = p["b2"] @ wp_ft + p["bp"]          # (1, D)

    return dict(
        D=D,                                                   # python int
        table=_pad2(table_fold, (Vp, Dp)).astype(jnp.bfloat16),
        w1=_pad2(p["w1"], (Fp, Hp)).astype(jnp.bfloat16),
        b1=_pad2(p["b1"], (1, Hp)),                            # f32
        w2=_pad2(w2_fold, (Hp, Dp)).astype(jnp.bfloat16),
        b_out=_pad2(b_out, (1, Dp)),                           # f32
    )


def reference_forward(user_ids, user_features, p):
    """Pure-JAX f32 reference, exactly mirroring the PyTorch module math."""
    emb = p["table"][user_ids]
    h = jnp.maximum(user_features @ p["w1"] + p["b1"], 0.0)
    femb = h @ p["w2"] + p["b2"]
    return jnp.concatenate([emb, femb], axis=-1) @ p["wp"] + p["bp"]


if __name__ == "__main__":
    B, user_num, D, F, H, padding_idx = 16, 32, 32, 16, 32, 0
    key = jax.random.PRNGKey(0)
    k_ids, k_feat, k_param = jax.random.split(key, 3)

    user_ids = jax.random.randint(k_ids, (B,), 0, user_num + 1, jnp.int32)
    user_features = jax.random.normal(k_feat, (B, F), jnp.float32)

    params = init_params(k_param, user_num, D, padding_idx, F, H)
    kparams = prepare_kernel_params(params)
    ref = reference_forward(user_ids, user_features, params)

    # Fast path (small folded table resident in VMEM).
    out_vmem = jax.block_until_ready(
        user_embedding_forward(user_ids, user_features, kparams))
    # General path (table in HBM, double-buffered row-gather DMAs) — forced by
    # setting the VMEM-residency threshold to 0.
    out_hbm = jax.block_until_ready(
        user_embedding_forward(user_ids, user_features, kparams,
                               vmem_table_limit_bytes=0))

    for name, out in (("vmem", out_vmem), ("hbm", out_hbm)):
        assert out.shape == (B, D), (name, out.shape)
        err = float(jnp.max(jnp.abs(out - ref)))
        # bf16 MXU operands + folded-projection reassociation vs f32 reference.
        assert jnp.allclose(out, ref, atol=1e-1, rtol=1e-1), (name, err)
    print("KERNEL_OK")
</pallas_src>

<mosaic_0001>
module attributes {stable_mosaic.version = 11 : i64} {
  func.func @_vmem_table_kernel(%arg0: i32, %arg1: memref<8x1xi32, #tpu.memory_space<vmem>>, %arg2: memref<8x128xf32, #tpu.memory_space<vmem>>, %arg3: memref<128x128xbf16, #tpu.memory_space<vmem>>, %arg4: memref<128x128xbf16, #tpu.memory_space<vmem>>, %arg5: memref<1x128xf32, #tpu.memory_space<vmem>>, %arg6: memref<128x128xbf16, #tpu.memory_space<vmem>>, %arg7: memref<1x128xf32, #tpu.memory_space<vmem>>, %arg8: memref<8x128xf32, #tpu.memory_space<vmem>>) attributes {dimension_semantics = [#tpu.dimension_semantics<parallel>], iteration_bounds = array<i64: 2>, scalar_prefetch = 0 : i64, scratch_operands = 0 : i64, tpu.core_type = #tpu.core_type<tc>, window_params = [{transform_indices = @transform_0, window_bounds = array<i64: 8, 1>}, {transform_indices = @transform_1, window_bounds = array<i64: 8, 128>}, {pipeline_mode = #tpu.pipeline_mode<synchronous>, transform_indices = @transform_2, window_bounds = array<i64: 128, 128>}, {pipeline_mode = #tpu.pipeline_mode<synchronous>, transform_indices = @transform_3, window_bounds = array<i64: 128, 128>}, {pipeline_mode = #tpu.pipeline_mode<synchronous>, transform_indices = @transform_4, window_bounds = array<i64: 1, 128>}, {pipeline_mode = #tpu.pipeline_mode<synchronous>, transform_indices = @transform_5, window_bounds = array<i64: 128, 128>}, {pipeline_mode = #tpu.pipeline_mode<synchronous>, transform_indices = @transform_6, window_bounds = array<i64: 1, 128>}, {transform_indices = @transform_7, window_bounds = array<i64: 8, 128>}]} {
    %c0 = arith.constant 0 : index
    %c0_0 = arith.constant 0 : index
    %0 = vector.load %arg1[%c0, %c0_0] : memref<8x1xi32, #tpu.memory_space<vmem>>, vector<8x1xi32>
    %1 = tpu.iota {dimensions = array<i32: 1>} : vector<8x128xi32>
    %2 = vector.broadcast %0 : vector<8x1xi32> to vector<8x128xi32>
    %3 = arith.cmpi eq, %1, %2 : vector<8x128xi32>
    %4 = arith.extui %3 : vector<8x128xi1> to vector<8x128xi32>
    %5 = arith.sitofp %4 : vector<8x128xi32> to vector<8x128xf32>
    %6 = arith.truncf %5 : vector<8x128xf32> to vector<8x128xbf16>
    %c0_1 = arith.constant 0 : index
    %c0_2 = arith.constant 0 : index
    %7 = vector.load %arg3[%c0_1, %c0_2] : memref<128x128xbf16, #tpu.memory_space<vmem>>, vector<128x128xbf16>
    %cst = arith.constant dense<0.000000e+00> : vector<8x128xf32>
    %8 = tpu.matmul %6, %7, %cst {dimension_numbers = #tpu.dot_dimension_numbers<[1], [0], [0], [1], [0, 0, 1, 1], [], []>} : vector<8x128xbf16>, vector<128x128xbf16>, vector<8x128xf32> -> vector<8x128xf32>
    %c0_3 = arith.constant 0 : index
    %c0_4 = arith.constant 0 : index
    %9 = vector.load %arg2[%c0_3, %c0_4] : memref<8x128xf32, #tpu.memory_space<vmem>>, vector<8x128xf32>
    %10 = arith.truncf %9 : vector<8x128xf32> to vector<8x128xbf16>
    %c0_5 = arith.constant 0 : index
    %c0_6 = arith.constant 0 : index
    %11 = vector.load %arg4[%c0_5, %c0_6] : memref<128x128xbf16, #tpu.memory_space<vmem>>, vector<128x128xbf16>
    %cst_7 = arith.constant dense<0.000000e+00> : vector<8x128xf32>
    %12 = tpu.matmul %10, %11, %cst_7 {dimension_numbers = #tpu.dot_dimension_numbers<[1], [0], [0], [1], [0, 0, 1, 1], [], []>} : vector<8x128xbf16>, vector<128x128xbf16>, vector<8x128xf32> -> vector<8x128xf32>
    %c0_8 = arith.constant 0 : index
    %c0_9 = arith.constant 0 : index
    %13 = vector.load %arg5[%c0_8, %c0_9] : memref<1x128xf32, #tpu.memory_space<vmem>>, vector<1x128xf32>
    %14 = vector.broadcast %13 : vector<1x128xf32> to vector<8x128xf32>
    %15 = arith.addf %12, %14 : vector<8x128xf32>
    %cst_10 = arith.constant 0.000000e+00 : f32
    %16 = vector.broadcast %cst_10 : f32 to vector<8x128xf32>
    %17 = arith.maximumf %15, %16 : vector<8x128xf32>
    %18 = arith.truncf %17 : vector<8x128xf32> to vector<8x128xbf16>
    %c0_11 = arith.constant 0 : index
    %c0_12 = arith.constant 0 : index
    %19 = vector.load %arg6[%c0_11, %c0_12] : memref<128x128xbf16, #tpu.memory_space<vmem>>, vector<128x128xbf16>
    %cst_13 = arith.constant dense<0.000000e+00> : vector<8x128xf32>
    %20 = tpu.matmul %18, %19, %cst_13 {dimension_numbers = #tpu.dot_dimension_numbers<[1], [0], [0], [1], [0, 0, 1, 1], [], []>} : vector<8x128xbf16>, vector<128x128xbf16>, vector<8x128xf32> -> vector<8x128xf32>
    %c0_14 = arith.constant 0 : index
    %c0_15 = arith.constant 0 : index
    %21 = vector.load %arg7[%c0_14, %c0_15] : memref<1x128xf32, #tpu.memory_space<vmem>>, vector<1x128xf32>
    %22 = vector.broadcast %21 : vector<1x128xf32> to vector<8x128xf32>
    %23 = arith.addf %20, %22 : vector<8x128xf32>
    %24 = arith.addf %8, %23 : vector<8x128xf32>
    %c0_16 = arith.constant 0 : index
    %c0_17 = arith.constant 0 : index
    %25 = vector.load %arg8[%c0_16, %c0_17] : memref<8x128xf32, #tpu.memory_space<vmem>>, vector<8x128xf32>
    tpu.vector_store %arg8[%c0_16, %c0_17], %24 {strides = array<i32>} : memref<8x128xf32, #tpu.memory_space<vmem>>, vector<8x128xf32>,
    return
  }
  func.func @transform_0(%arg0: i32) -> (i32, i32) {
    %c0_i32 = arith.constant 0 : i32
    %c0_i32_0 = arith.constant 0 : i32
    return %arg0, %c0_i32 : i32, i32
  }
  func.func @transform_1(%arg0: i32) -> (i32, i32) {
    %c0_i32 = arith.constant 0 : i32
    %c0_i32_0 = arith.constant 0 : i32
    return %arg0, %c0_i32 : i32, i32
  }
  func.func @transform_2(%arg0: i32) -> (i32, i32) {
    %c0_i32 = arith.constant 0 : i32
    %c0_i32_0 = arith.constant 0 : i32
    %c0_i32_1 = arith.constant 0 : i32
    return %c0_i32, %c0_i32_0 : i32, i32
  }
  func.func @transform_3(%arg0: i32) -> (i32, i32) {
    %c0_i32 = arith.constant 0 : i32
    %c0_i32_0 = arith.constant 0 : i32
    %c0_i32_1 = arith.constant 0 : i32
    return %c0_i32, %c0_i32_0 : i32, i32
  }
  func.func @transform_4(%arg0: i32) -> (i32, i32) {
    %c0_i32 = arith.constant 0 : i32
    %c0_i32_0 = arith.constant 0 : i32
    %c0_i32_1 = arith.constant 0 : i32
    return %c0_i32, %c0_i32_0 : i32, i32
  }
  func.func @transform_5(%arg0: i32) -> (i32, i32) {
    %c0_i32 = arith.constant 0 : i32
    %c0_i32_0 = arith.constant 0 : i32
    %c0_i32_1 = arith.constant 0 : i32
    return %c0_i32, %c0_i32_0 : i32, i32
  }
  func.func @transform_6(%arg0: i32) -> (i32, i32) {
    %c0_i32 = arith.constant 0 : i32
    %c0_i32_0 = arith.constant 0 : i32
    %c0_i32_1 = arith.constant 0 : i32
    return %c0_i32, %c0_i32_0 : i32, i32
  }
  func.func @transform_7(%arg0: i32) -> (i32, i32) {
    %c0_i32 = arith.constant 0 : i32
    %c0_i32_0 = arith.constant 0 : i32
    return %arg0, %c0_i32 : i32, i32
  }
}

</mosaic_0001>

<bundles_post_ra>
// kernel: _forward_vmem.1
= control target key start
LH: loop header
LB: loop body
LE: loop exit
PB: predicated region body
PF: predicated region fallthrough
CT: control target
= control target key end

     0   :  { %12 = vsyncpa [#allocation3], 0  ;;  %s1493_s0 = inlined_call_operand.vmem [shape: s32[16,1], index: 0, kind: input, shape index: {}]   ;;  %s1494_s1 = inlined_call_operand.vmem [shape: f32[16,128], index: 1, kind: input, shape index: {}]   ;;  %s1495_s2 = inlined_call_operand.hbm [shape: bf16[128,128], index: 2, kind: input, shape index: {}]   ;;  %s1496_s3 = inlined_call_operand.hbm [shape: bf16[128,128], index: 3, kind: input, shape index: {}]   ;;  %s1497_s4 = inlined_call_operand.vmem [shape: f32[1,128], index: 4, kind: input, shape index: {}]   ;;  %s1498_s5 = inlined_call_operand.hbm [shape: bf16[128,128], index: 5, kind: input, shape index: {}]   ;;  %s1499_s6 = inlined_call_operand.vmem [shape: f32[1,128], index: 6, kind: input, shape index: {}]   ;;  %s1500_s7 = inlined_call_operand.hbm [shape: f32[16,128], index: 7, kind: output, shape index: {}]  }
   0x1   :  { %13 = vsyncpa [#allocation6], 0 }
   0x2   :  { %14 = vsyncpa [#allocation4], 0 }
   0x3   :  { %16 = vsyncpa [#allocation4 + $0x1], 0  ;;  %s1238_s24 = smov 0   ;;  %s1240_s25 = smov 0  }
   0x4   :  { %s1242_s26 = smov 0   ;;  %s1244_s27 = smov 0  }
   0x5 LB: > { %1507 = sst [smem:[#allocation12_spill]] %s1182_s26  ;;  %s1259_s28 = sadd.s32 4294967295, %s1186_s27   ;;  %s1186_s27 = sphi %s1244_s27, %s1522_s27   ;;  %s1182_s26 = sphi %s1242_s26, %s1524_s26   ;;  %s1178_s25 = sphi %s1240_s25, %s1526_s25   ;;  %s1174_s24 = sphi %s1238_s24, %s1525_s24  }
   0x6   : > { %s793_s29 = sadd.s32 4294967294, %s1186_s27   ;;  %s1263_s30 = sadd.s32 1, %s1186_s27  }
   0x7   : > { %1508 = sst [smem:[#allocation13_spill]] %s1263_s30  ;;  %s186_s8 = sadd.s32 1, %s1182_s26 }
   0x8   : > { %s183_s9 = ssub.s32 %s1186_s27, %s1263_s30  ;;  %p196_p0 = scmp.ne.s32.totalorder %s1182_s26, %s1178_s25 }
   0x9   : > { %p184_p1 = scmp.eq.s32.totalorder %s183_s9, 0  ;;  %p197_p2 = scmp.eq.s32.totalorder %s1259_s28, 1 }
   0xa   : > { %p202_p3 = scmp.ne.s32.totalorder %s1178_s25, %s1174_s24  ;;  %p203_p4 = scmp.eq.s32.totalorder %s793_s29, 1 }
   0xb   : > { %s1274_s10 = scalar_select %p184_p1, %s1182_s26, %s186_s8  }
   0xc   : > { %p1276_p5 = por %p197_p2, %p196_p0  ;;  %p1280_p6 = por %p203_p4, %p202_p3 }
   0xd   : > { %1509 = sst [smem:[#allocation14_spill]] %s1274_s10  ;;  %p794_p7 = scmp.ge.s32.totalorder %s1186_s27, 1 }
   0xe   : > { %s1510_s11 = scalar_select %p1276_p5, 1, 0 }
   0xf   : > { %s1511_s12 = scalar_select %p1280_p6, 1, 0 }
  0x10   : > { %p210_p8 = scmp.lt.s32.totalorder %s1186_s27, 3  ;;  %p1501_p9 = scmp.eq.s32.totalorder %s1259_s28, 0 }
  0x11   : > { %s1188_s14 = smov [#allocation5]   ;;  %s1189_s17 = smov [#allocation2]  }
  0x12   : > { %p1287_p10 = pnand %p794_p7, %p210_p8  ;;  %s235_s15 = sshll.u32 %s1188_s14, 4  ;;  %s1293_s15 = int_to_ptr.vmem [resolvable:$true] %s235_s15 }
  0x13   : > { %s222_s18 = sshll.u32 %s1189_s17, 4  ;;  %s1190_s19 = smov [#allocation7]   ;;  %s1301_s18 = int_to_ptr.vmem [resolvable:$true] %s222_s18 }
  0x14   : > { %s1512_s13 = scalar_select %p1287_p10, 1, 0 }
  0x15   : > { %p945_p11 = pneg %p1287_p10  ;;  %s1303_s20 = sshll.u32 %s1190_s19, 4  ;;  %s252_s20 = int_to_ptr.vmem [resolvable:$true] %s1303_s20 }
  0x16   : > { %s1032_s23 = scalar_lea.hbm %s1496_s3, 1024 }
  0x17   : > { %p1297_p12 = pnand %p1501_p9, %p945_p11  ;;  %p1033_p13 = scmp.ne.s32.totalorder %s1496_s3, %s1032_s23 }
  0x18   : > { %p1039_p3 = scmp.lt.u32.totalorder %s1032_s23, %s1496_s3 }
  0x19   : > { %p1313_p0 = pneg %p1297_p12 }
  0x1b   : > { %p1035_p1 = pnand %p1313_p0, %p1033_p13 }
  0x1d   : > { %p1036_p2 = pneg %p1035_p1 }
  0x1f   : > { %p1041_p4 = pnand %p1039_p3, %p1036_p2 }
  0x21   : > { %1044 = shalt.err (!%p1041_p4)
}
  0x22   : > { %s1045_s19 = scalar_lea.vmem %s1293_s15, 1024  ;;  %p1053_p9 = scmp.lt.s32.totalorder %s1293_s15, %s1293_s15 }
  0x23   : > { %p1046_p7 = scmp.ne.s32.totalorder %s1293_s15, %s1045_s19  ;;  %p1054_p6 = scmp.lt.s32.totalorder %s1045_s19, %s1045_s19 }
  0x25   : > { %p1048_p8 = pnand %p1046_p7, %p1313_p0  ;;  %p1055_p13 = por %p1054_p6, %p1053_p9 }
  0x27   : > { %p1049_p11 = pneg %p1048_p8 }
  0x29   : > { %p1056_p1 = pnand %p1055_p13, %p1049_p11 }
  0x2b   : > { %1059 = shalt.err (!%p1056_p1)
}
  0x2c   : > { %s1191_s21 = smov 64   ;;  %s1192_s22 = smov 4  }
  0x2d   : > { %951 = dma.hbm_to_vmem [thread:$0]  (!%p1297_p12), %s1496_s3, 1024, %s1293_s15, [#allocation6], %s1191_s21, %s1191_s21, %s1192_s22  }
  0x2e   : > { %s1060_s17 = scalar_lea.hbm %s1495_s2, 1024 }
  0x2f   : > { %p1061_p6 = scmp.ne.s32.totalorder %s1495_s2, %s1060_s17  ;;  %p1067_p3 = scmp.lt.u32.totalorder %s1060_s17, %s1495_s2 }
  0x31   : > { %p1063_p9 = pnand %p1061_p6, %p1313_p0 }
  0x33   : > { %p1064_p2 = pneg %p1063_p9 }
  0x35   : > { %p1069_p4 = pnand %p1067_p3, %p1064_p2 }
  0x37   : > { %1072 = shalt.err (!%p1069_p4)
}
  0x38   : > { %s1073_s15 = scalar_lea.vmem %s1301_s18, 1024  ;;  %p1081_p13 = scmp.lt.s32.totalorder %s1301_s18, %s1301_s18 }
  0x39   : > { %p1074_p7 = scmp.ne.s32.totalorder %s1301_s18, %s1073_s15  ;;  %p1082_p1 = scmp.lt.s32.totalorder %s1073_s15, %s1073_s15 }
  0x3b   : > { %p1076_p8 = pnand %p1074_p7, %p1313_p0  ;;  %p1083_p6 = por %p1082_p1, %p1081_p13 }
  0x3d   : > { %p1077_p11 = pneg %p1076_p8 }
  0x3f   : > { %p1084_p9 = pnand %p1083_p6, %p1077_p11 }
  0x41   : > { %1087 = shalt.err (!%p1084_p9)
}
  0x42   : > { %948 = dma.hbm_to_vmem [thread:$0]  (!%p1297_p12), %s1495_s2, 1024, %s1301_s18, [#allocation3], %s1191_s21, %s1191_s21, %s1192_s22  }
  0x43   : > { %s1088_s29 = scalar_lea.hbm %s1498_s5, 1024 }
  0x44   : > { %p1089_p2 = scmp.ne.s32.totalorder %s1498_s5, %s1088_s29  ;;  %p1095_p7 = scmp.lt.u32.totalorder %s1088_s29, %s1498_s5 }
  0x46   : > { %p1091_p3 = pnand %p1089_p2, %p1313_p0 }
  0x48   : > { %p1092_p4 = pneg %p1091_p3 }
  0x4a   : > { %p1097_p8 = pnand %p1095_p7, %p1092_p4 }
  0x4c   : > { %1100 = shalt.err (!%p1097_p8)
}
  0x4d   : > { %s1101_s15 = scalar_lea.vmem %s252_s20, 1024  ;;  %p1109_p6 = scmp.lt.s32.totalorder %s252_s20, %s252_s20 }
  0x4e   : > { %p1102_p11 = scmp.ne.s32.totalorder %s252_s20, %s1101_s15  ;;  %p1110_p9 = scmp.lt.s32.totalorder %s1101_s15, %s1101_s15 }
  0x50   : > { %p1104_p13 = pnand %p1102_p11, %p1313_p0  ;;  %p1111_p5 = por %p1110_p9, %p1109_p6 }
  0x52   : > { %p1105_p1 = pneg %p1104_p13 }
  0x54   : > { %p1112_p10 = pnand %p1111_p5, %p1105_p1 }
  0x56   : > { %1115 = shalt.err (!%p1112_p10)
}
  0x57   : > { %954 = dma.hbm_to_vmem [thread:$0]  (!%p1297_p12), %s1498_s5, 1024, %s252_s20, [#allocation6], %s1191_s21, %s1191_s21, %s1192_s22  }
  0x58   : > { %p1515_p2 = scmp.ne.s32.totalorder %s1512_s13, 0 }
  0x59   : > { %p1516_p0 = scmp.eq.s32.totalorder (!%p1515_p2), %s1259_s28, 0 }
  0x5a   : > { %284 = sbr.rel (%p1515_p2) target bundleno = 613 (0x265), region = 48 }
  0x61   : > { %1161 = dma.done.wait (%p1516_p0), [#allocation3], 1024   ;;  %p1517_p3 = pmov %p1516_p0 }
  0x62   : > { %p1518_p5 = pmov %p1516_p0 }
  0x63   : > { %1163 = vsyncadd (%p1517_p3), [#allocation3], 4294966272 }
  0x64   : > { %1165 = dma.done.wait (%p1518_p5), [#allocation6], 2048   ;;  %p1519_p10 = pmov %p1516_p0 }
  0x65   : > { %v1193_v0 = vmov 0.0   ;;  %vm1194_vm0 = vmmov 0   ;;  %v1195_v1 = vmov 0   ;;  %p327_p12 = scmp.lt.s32.totalorder %s1259_s28, 1  ;;  %v1008_v2 = vld [vmem:[#allocation5] sm:$0xff]   ;;  %v1009_v3 = vld [vmem:[#allocation5 + $0x8] sm:$0xff]   ;;  %v337_v35 = vlaneseq }
  0x66   : > { %1167 = vsyncadd (%p1519_p10), [#allocation6], 4294965248  ;;  %866 = vmatprep.subr.bf16.mxu0 %v1193_v0  ;;  %882 = vmatprep.mubr.msk.bf16.mxu0 %vm1194_vm0, %v1193_v0  ;;  %v1010_v4 = vld [vmem:[#allocation5 + $0x10] sm:$0xff]   ;;  %v1016_v6 = vld [vmem:[#allocation7] sm:$0xff]   ;;  %v1196_v40 = vmov 1.0|1.0  }
  0x67   : > { %1007 = vset.pattern.permute.xlu0 %v1195_v1  ;;  %886 = vmatprep.subr.bf16.mxu1 %v1193_v0  ;;  %s1403_s13 = scalar_select %p327_p12, %s1259_s28, 1  ;;  %v1011_v7 = vld [vmem:[#allocation5 + $0x18] sm:$0xff]   ;;  %v1017_v8 = vld [vmem:[#allocation7 + $0x8] sm:$0xff]   ;;  %v1012_v9 = vld [vmem:[#allocation5 + $0x20] sm:$0xff]   ;;  %v338_v37 = vand.u32 127, %v337_v35 }
  0x68   : > { %902 = vmatprep.mubr.msk.bf16.mxu1 %vm1194_vm0, %v1193_v0  ;;  %867 = vmatpush3.bf16.msra.mxu0 %v1008_v2  ;;  %v1018_v10 = vld [vmem:[#allocation7 + $0x10] sm:$0xff]   ;;  %v1013_v11 = vld [vmem:[#allocation5 + $0x28] sm:$0xff]   ;;  %v1019_v12 = vld [vmem:[#allocation7 + $0x18] sm:$0xff]   ;;  %s324_s8 = sand.u32 1, %s1178_s25   ;;  %s836_s15 = sshll.u32 %s1259_s28, 7 }
  0x69   : > { %868 = vmatprep.subr.bf16.mxu0 %v1193_v0  ;;  %s804_s16 = sshll.u32 %s1403_s13, 3  ;;  %887 = vmatpush3.bf16.msra.mxu1 %v1016_v6  ;;  %v1014_v13 = vld [vmem:[#allocation5 + $0x30] sm:$0xff]   ;;  %v1020_v14 = vld [vmem:[#allocation7 + $0x20] sm:$0xff]   ;;  %v1015_v15 = vld [vmem:[#allocation5 + $0x38] sm:$0xff]   ;;  %s803_s14 = sshll.u32 %s324_s8, 3 }
  0x6a   : > { %s330_s21 = scalar_lea.vmem %s1493_s0, %s804_s16  ;;  %888 = vmatprep.subr.bf16.mxu1 %v1193_v0  ;;  %s334_s10 = scalar_lea.vmem %s1494_s1, %s804_s16  ;;  %v1021_v17 = vld [vmem:[#allocation7 + $0x28] sm:$0xff]   ;;  %v1022_v19 = vld [vmem:[#allocation7 + $0x30] sm:$0xff]   ;;  %v1023_v20 = vld [vmem:[#allocation7 + $0x38] sm:$0xff]  }
  0x6b   : > { %v336_v5 = vld [vmem:[%s330_s21] sm:$0xff]  ;;  %v1024_v28 = vld [vmem:[#allocation2] sm:$0xff]   ;;  %v1025_v30 = vld [vmem:[#allocation2 + $0x8] sm:$0xff]   ;;  %s326_s18 = scalar_lea.vmem [#allocation8], %s803_s14  ;;  %s1451_s20 = scalar_lea.hbm %s1500_s7, %s836_s15 }
  0x6c   : > { %869 = vmatpush3.bf16.msra.mxu0 %v1009_v3  ;;  %340 = vperm.xlu0 %1007, %v336_v5   ;;  %v362_v16 = vld [vmem:[%s334_s10] sm:$0xff]  ;;  %v1027_v32 = vld [vmem:[#allocation2 + $0x18] sm:$0xff]   ;;  %v1028_v33 = vld [vmem:[#allocation2 + $0x20] sm:$0xff]   ;;  %s691_s26 = sshll.u32 %s326_s18, 4  ;;  %s678_s9 = scalar_lea.sflag [#allocation4], %s324_s8  ;;  %s1453_s26 = int_to_ptr.vmem [resolvable:$true] %s691_s26 }
  0x6d   : > { %870 = vmatprep.subr.bf16.mxu0 %v1193_v0  ;;  %889 = vmatpush3.bf16.msra.mxu1 %v1017_v8  ;;  %v363_v18 = vpack.c.bf16 %v362_v16, %v362_v16  ;;  %v807_v21 = vld [vmem:[%s1497_s4] ss:$0 sm:$0xff]  ;;  %v1029_v34 = vld [vmem:[#allocation2 + $0x28] sm:$0xff]   ;;  %v1031_v39 = vld [vmem:[#allocation2 + $0x38] sm:$0xff]   ;;  %s1116_s28 = scalar_lea.vmem %s1453_s26, 128  ;;  %p1520_p7 = scmp.ne.s32.totalorder %s1510_s11, 0 }
  0x6e   : > { %890 = vmatprep.subr.bf16.mxu1 %v1193_v0  ;;  %v1026_v31 = vld [vmem:[#allocation2 + $0x10] sm:$0xff]   ;;  %p1117_p4 = scmp.ne.s32.totalorder %s1453_s26, %s1116_s28  ;;  %s1197_s21 = smov [#allocation8]  }
  0x6f   : > { %v1030_v36 = vld [vmem:[#allocation2 + $0x30] sm:$0xff]   ;;  %s1120_s22 = sshll.u32 %s1197_s21, 4  ;;  %s1121_s22 = int_to_ptr.vmem [resolvable:$false] %s1120_s22 }
  0x70   : > { %871 = vmatpush3.bf16.msra.mxu0 %v1010_v4  ;;  %v816_v41 = vld [vmem:[%s1499_s6] ss:$0 sm:$0xff]  ;;  %p1118_p8 = pnand %p1117_p4, %p1520_p7  ;;  %s1122_s30 = scalar_lea.vmem %s1121_s22, 256 }
  0x71   : > { %872 = vmatprep.subr.bf16.mxu0 %v1193_v0  ;;  %891 = vmatpush3.bf16.msra.mxu1 %v1018_v10  ;;  %p1123_p13 = scmp.lt.s32.totalorder %s1453_s26, %s1121_s22  ;;  %p1124_p1 = scmp.lt.s32.totalorder %s1122_s30, %s1116_s28 }
  0x72   : > { %892 = vmatprep.subr.bf16.mxu1 %v1193_v0  ;;  %p1119_p11 = pneg %p1118_p8 }
  0x73   : > { %p1125_p6 = por %p1124_p1, %p1123_p13 }
  0x74   : > { %873 = vmatpush3.bf16.msra.mxu0 %v1011_v7 }
  0x75   : > { %874 = vmatprep.subr.bf16.mxu0 %v1193_v0  ;;  %893 = vmatpush3.bf16.msra.mxu1 %v1019_v12  ;;  %p1126_p9 = pnand %p1125_p6, %p1119_p11 }
  0x76   : > { %894 = vmatprep.subr.bf16.mxu1 %v1193_v0 }
  0x78   : > { %875 = vmatpush3.bf16.msra.mxu0 %v1012_v9 }
  0x79   : > { %876 = vmatprep.subr.bf16.mxu0 %v1193_v0  ;;  %895 = vmatpush3.bf16.msra.mxu1 %v1020_v14 }
  0x7a   : > { %896 = vmatprep.subr.bf16.mxu1 %v1193_v0 }
  0x7c   : > { %877 = vmatpush3.bf16.msra.mxu0 %v1013_v11 }
  0x7d   : > { %878 = vmatprep.subr.bf16.mxu0 %v1193_v0  ;;  %897 = vmatpush3.bf16.msra.mxu1 %v1021_v17 }
  0x7e   : > { %898 = vmatprep.subr.bf16.mxu1 %v1193_v0 }
  0x80   : > { %879 = vmatpush3.bf16.msra.mxu0 %v1014_v13 }
  0x81   : > { %880 = vmatprep.subr.bf16.mxu0 %v1193_v0  ;;  %899 = vmatpush3.bf16.msra.mxu1 %v1022_v19 }
  0x82   : > { %900 = vmatprep.subr.bf16.mxu1 %v1193_v0 }
  0x84   : > { %881 = vmatpush3.bf16.msra.mxu0 %v1015_v15 }
  0x85   : > { %901 = vmatpush3.bf16.msra.mxu1 %v1023_v20 }
  0x86   : > { %906 = vmatprep.subr.bf16.mxu1 %v1193_v0 }
  0x87   : > { %883 = vmatmul.mubr.bf16.vlgmr.msra.gmra.mrb[0].mxu0 %v363_v18 }
  0xeb   : > { %v341_v38 = vpop.permute.xlu0 %340 }
  0xec   : > { %vm342_vm1 = vcmp.eq.s32.totalorder %v338_v37, %v341_v38 }
  0xed   : > { %vm833_vm2 = vmpackc.low %vm342_vm1, %vm342_vm1 }
 0x15a   : > { %v469_v22 = vpop.f32.mrb[0].mxu0 }
 0x15b   : > { %v470_v23 = vadd.f32 %v807_v21, %v469_v22  ;;  %v884_v24 = vpop.f32.mrb[1].mxu0 }
 0x15c   : > { %v472_v25 = vpop.f32.mrb[2].mxu0 }
 0x15d   : > { %v475_v26 = vmax.f32 %v470_v23, 0.0  ;;  %v885_v27 = vpop.f32.mrb[3].mxu0 }
 0x15f   : > { %v476_v29 = vpack.c.bf16 %v475_v26, %v475_v26 }
 0x161   : > { %903 = vmatmul.mubr.bf16.vlgmr.msra.gmra.mrb[0].mxu1 %v476_v29 }
 0x162   : > { %907 = vmatpush3.bf16.msra.mxu1 %v1024_v28  ;;  %922 = vmatprep.mubr.msk.bf16.mxu1 %vm1194_vm0, %v1193_v0 }
 0x163   : > { %908 = vmatprep.subr.bf16.mxu1 %v1193_v0 }
 0x166   : > { %909 = vmatpush3.bf16.msra.mxu1 %v1025_v30 }
 0x167   : > { %910 = vmatprep.subr.bf16.mxu1 %v1193_v0 }
 0x16a   : > { %911 = vmatpush3.bf16.msra.mxu1 %v1026_v31 }
 0x16b   : > { %912 = vmatprep.subr.bf16.mxu1 %v1193_v0 }
 0x16e   : > { %913 = vmatpush3.bf16.msra.mxu1 %v1027_v32 }
 0x16f   : > { %914 = vmatprep.subr.bf16.mxu1 %v1193_v0 }
 0x172   : > { %915 = vmatpush3.bf16.msra.mxu1 %v1028_v33 }
 0x173   : > { %916 = vmatprep.subr.bf16.mxu1 %v1193_v0 }
 0x176   : > { %917 = vmatpush3.bf16.msra.mxu1 %v1029_v34 }
 0x177   : > { %918 = vmatprep.subr.bf16.mxu1 %v1193_v0 }
 0x17a   : > { %919 = vmatpush3.bf16.msra.mxu1 %v1030_v36 }
 0x17b   : > { %920 = vmatprep.subr.bf16.mxu1 %v1193_v0 }
 0x17e   : > { %921 = vmatpush3.bf16.msra.mxu1 %v1031_v39 }
 0x181   : > { %923 = vmatmul.mubr.msk.bf16.vlgmr.msra.gmra.mrb[0].mxu1 %vm833_vm2, %v1196_v40 }
 0x254   : > { %v670_v42 = vpop.f32.mrb[0].mxu1 }
 0x255   : > { %v926_v43 = vadd.f32 %v816_v41, %v670_v42  ;;  %v924_v44 = vpop.f32.mrb[1].mxu1 }
 0x256   : > { %v673_v45 = vpop.f32.mrb[2].mxu1 }
 0x257   : > { %676 = vst [vmem:[%s326_s18] sm:$0xff] %v926_v43  ;;  %v925_v46 = vpop.f32.mrb[3].mxu1 }
 0x258   : > { %1129 = shalt.err (!%p1126_p9)
}
 0x259   : > { %s1130_s10 = scalar_lea.hbm %s1451_s20, 128  ;;  %s1134_s8 = scalar_lea.hbm %s1500_s7, 256 }
 0x25a   : > { %p1131_p2 = scmp.ne.s32.totalorder %s1451_s20, %s1130_s10  ;;  %p1135_p5 = scmp.lt.u32.totalorder %s1451_s20, %s1500_s7 }
 0x25b   : > { %p1136_p10 = scmp.lt.u32.totalorder %s1134_s8, %s1130_s10  ;;  %p1138_p4 = scmp.lt.u32.totalorder %s1130_s10, %s1451_s20 }
 0x25c   : > { %p1132_p0 = pnand %p1131_p2, %p1520_p7 }
 0x25d   : > { %p1137_p12 = por %p1136_p10, %p1135_p5 }
 0x25e   : > { %p1133_p3 = pneg %p1132_p0 }
 0x25f   : > { %p1139_p8 = por %p1138_p4, %p1137_p12 }
 0x261   : > { %p1140_p11 = pnand %p1139_p8, %p1133_p3 }
 0x263   : > { %1143 = shalt.err (!%p1140_p11)
}
 0x264   : > { %943 = dma.vmem_to_hbm [thread:$0]  (%p1520_p7), %s1453_s26, 128, %s1451_s20, %s678_s9  }
 0x265 PF: > { %p965_p13 = scmp.ge.s32.totalorder %s1186_s27, 2  ;;  %s703_s19 = sand.u32 1, %s1174_s24  }
 0x266   : > { %p1521_p1 = scmp.ne.s32.totalorder %s1511_s12, 0  ;;  %s704_s15 = scalar_lea.sflag [#allocation4], %s703_s19 }
 0x268   : > { %p956_p6 = pnand %p965_p13, %p1521_p1 }
 0x26a   : > { %1169 = dma.done.wait (!%p956_p6), %s704_s15, 128  }
 0x26b   : > { %1171 = vsyncadd (!%p956_p6), %s704_s15, 4294967168  ;;  %s1522_s27 = sld [smem:[#allocation13_spill]]  ;;  %s1523_s18 = sld [smem:[#allocation12_spill]] }
 0x26c   : > { %s1524_s26 = sld [smem:[#allocation14_spill]]  ;;  %s1525_s24 = smov %s1178_s25 }
 0x271   : > { %p19_p9 = scmp.ge.s32.totalorder %s1522_s27, 4   ;;  %s1526_s25 = smov %s1523_s18 }
 0x273   :  { %21 = sbr.rel (!%p19_p9) target bundleno = 5 (0x5), region = 99 }
 0x27a   :  { %709 = vsyncpa [#allocation3], 1 }
 0x27b   :  { %711 = vsyncpa [#allocation3 + $0x1], 1 }
 0x27c   :  { %712 = vsyncpa [#allocation6], 1 }
 0x27d   :  { %713 = vsyncpa [#allocation4], 1 }
 0x27e   :  { %715 = vsyncpa [#allocation4 + $0x1], 1 }

</bundles_post_ra>
